<compile_context>
chip_gen: v6e
topology: v6e:2x2x1
jax: 0.10.0
libtpu: 0.0.40
codegen_flags: <defaults>
</compile_context>

<pallas_src>
import functools
from typing import NamedTuple

import jax
import jax.numpy as jnp
from jax.experimental import pallas as pl
from jax.experimental.pallas import tpu as pltpu


def _round_up(x, m):
    return ((x + m - 1) // m) * m


def _pad2d(a, shape, dtype=None):
    """Zero-pad a 2-D array up to `shape`, optionally casting."""
    out = jnp.zeros(shape, a.dtype if dtype is None else dtype)
    return out.at[: a.shape[0], : a.shape[1]].set(a.astype(out.dtype))


# ----------------------------- kernel ---------------------------------------


def vae_kernel(
    x_ref, eps_ref,
    w_e1_ref, b_e1_ref,
    w_e2_ref, b_e2_ref,
    w_heads_ref, b_heads_ref,
    w_di_ref, b_di_ref,
    w_do_ref, b_do_ref,
    recon_ref, mu_ref, logvar_ref,
):
    cdt = w_e1_ref.dtype  # bf16 MXU operand dtype

    x = x_ref[...]

    # ---- encoder: Linear -> ReLU -> Linear -> ReLU (bf16 operands, f32 accumulate) ----
    h1 = jnp.dot(x, w_e1_ref[...], preferred_element_type=jnp.float32) + b_e1_ref[...]
    h1 = jnp.maximum(h1, 0.0).astype(cdt)
    h2 = jnp.dot(h1, w_e2_ref[...], preferred_element_type=jnp.float32) + b_e2_ref[...]
    h2 = jnp.maximum(h2, 0.0).astype(cdt)

    # ---- fused latent heads: [ mu | logvar ], split on a 128-lane boundary ----
    heads = (
        jnp.dot(h2, w_heads_ref[...], preferred_element_type=jnp.float32)
        + b_heads_ref[...]
    )
    l_pad = mu_ref.shape[-1]
    mu = heads[:, :l_pad]
    logvar = heads[:, l_pad:]

    # ---- reparameterize: z = mu + eps * exp(0.5 * logvar)  (f32) ----
    std = jnp.exp(0.5 * logvar)
    z = (mu + eps_ref[...] * std).astype(cdt)

    # ---- decoder: Linear -> ReLU -> Linear -> Sigmoid ----
    hd = jnp.dot(z, w_di_ref[...], preferred_element_type=jnp.float32) + b_di_ref[...]
    hd = jnp.maximum(hd, 0.0).astype(cdt)
    out = jnp.dot(hd, w_do_ref[...], preferred_element_type=jnp.float32) + b_do_ref[...]
    recon = jax.nn.sigmoid(out)  # exp + reciprocal ride the EUP slot

    recon_ref[...] = recon.astype(recon_ref.dtype)
    mu_ref[...] = mu.astype(mu_ref.dtype)
    logvar_ref[...] = logvar.astype(logvar_ref.dtype)


# ------------------------- parameter packing (once) -------------------------


class PackedVAEParams(NamedTuple):
    arrays: dict        # padded / bf16-cast weight & bias arrays
    input_dim: int
    latent_dim: int


def pack_params(params):
    """Pad/cast/concat all weights ONCE.  Per-call work only touches x/eps."""
    input_dim = params["w_do"].shape[1]
    h1_dim = params["w_e1"].shape[1]
    h2_dim = params["w_e2"].shape[1]
    latent_dim = params["w_mu"].shape[1]

    d_p = _round_up(input_dim, 128)
    h1_p = _round_up(h1_dim, 128)
    h2_p = _round_up(h2_dim, 128)
    l_p = _round_up(latent_dim, 128)

    cdt = jnp.bfloat16  # MXU operand dtype (f32 accumulate inside the kernel)
    arrays = dict(
        w_e1=_pad2d(params["w_e1"], (d_p, h1_p), cdt),
        b_e1=_pad2d(params["b_e1"], (1, h1_p), jnp.float32),
        w_e2=_pad2d(params["w_e2"], (h1_p, h2_p), cdt),
        b_e2=_pad2d(params["b_e2"], (1, h2_p), jnp.float32),
        # fused latent heads: [ mu | logvar ], split on a 128-lane boundary in-kernel
        w_heads=jnp.concatenate(
            [_pad2d(params["w_mu"], (h2_p, l_p), cdt),
             _pad2d(params["w_lv"], (h2_p, l_p), cdt)], axis=1),
        b_heads=jnp.concatenate(
            [_pad2d(params["b_mu"], (1, l_p), jnp.float32),
             _pad2d(params["b_lv"], (1, l_p), jnp.float32)], axis=1),
        w_di=_pad2d(params["w_di"], (l_p, h2_p), cdt),
        b_di=_pad2d(params["b_di"], (1, h2_p), jnp.float32),
        w_do=_pad2d(params["w_do"], (h2_p, d_p), cdt),
        b_do=_pad2d(params["b_do"], (1, d_p), jnp.float32),
    )
    return PackedVAEParams(arrays=arrays, input_dim=input_dim, latent_dim=latent_dim)


# ------------------------------ forward --------------------------------------


@functools.partial(
    jax.jit,
    static_argnames=("input_dim", "latent_dim", "block_batch", "recon_dtype"),
)
def _vae_forward_impl(x, eps, w, *, input_dim, latent_dim, block_batch, recon_dtype):
    d_p, h1_p = w["w_e1"].shape
    h2_p = w["w_e2"].shape[1]
    l_p = w["w_di"].shape[0]

    x_flat = x.reshape(-1, input_dim)  # same semantics as torch .view(-1, input_dim)
    b = x_flat.shape[0]

    # ---- batch tile: multiple of 16 (bf16 sublane packing), <=512 rows;
    #      split into >=2 tiles when possible so both v7x TensorCores get work ----
    b16 = _round_up(b, 16)
    if block_batch is not None:
        tb = max(16, _round_up(block_batch, 16))
    else:
        tb = min(512, b16)
        if tb == b16 and b16 >= 32:
            tb = _round_up((b16 + 1) // 2, 16)
    b_p = _round_up(b, tb)

    cdt = jnp.bfloat16
    x_p = _pad2d(x_flat, (b_p, d_p), cdt)          # fused with the kernel prologue (jit)
    eps_p = _pad2d(eps, (b_p, l_p), jnp.float32)

    grid = (b_p // tb,)
    batch_map = lambda i: (i, 0)      # batch-tiled arrays
    resident_map = lambda i: (0, 0)   # weights stay VMEM-resident across the grid

    in_specs = [
        pl.BlockSpec((tb, d_p), batch_map),                 # x
        pl.BlockSpec((tb, l_p), batch_map),                 # eps
        pl.BlockSpec((d_p, h1_p), resident_map),            # w_e1
        pl.BlockSpec((1, h1_p), resident_map),              # b_e1
        pl.BlockSpec((h1_p, h2_p), resident_map),           # w_e2
        pl.BlockSpec((1, h2_p), resident_map),               # b_e2
        pl.BlockSpec((h2_p, 2 * l_p), resident_map),        # w_heads (mu|logvar)
        pl.BlockSpec((1, 2 * l_p), resident_map),           # b_heads
        pl.BlockSpec((l_p, h2_p), resident_map),            # w_di
        pl.BlockSpec((1, h2_p), resident_map),               # b_di
        pl.BlockSpec((h2_p, d_p), resident_map),            # w_do
        pl.BlockSpec((1, d_p), resident_map),               # b_do
    ]
    out_specs = (
        pl.BlockSpec((tb, d_p), batch_map),                 # recon
        pl.BlockSpec((tb, l_p), batch_map),                 # mu
        pl.BlockSpec((tb, l_p), batch_map),                 # logvar
    )

    # ---- advisory cost model for XLA scheduling around the custom call ----
    weight_bytes = sum(int(v.size) * v.dtype.itemsize for v in w.values())
    recon_bytes = jnp.dtype(recon_dtype).itemsize
    flops = 2 * b_p * (d_p * h1_p + h1_p * h2_p + h2_p * 2 * l_p + l_p * h2_p + h2_p * d_p)
    transcendentals = b_p * (l_p + d_p)              # exp(0.5*logvar) + sigmoid
    bytes_accessed = (
        b_p * d_p * 2 + b_p * l_p * 4 + weight_bytes           # inputs
        + b_p * d_p * recon_bytes + 2 * b_p * l_p * 4          # outputs
    )
    cost = pl.CostEstimate(
        flops=flops, transcendentals=transcendentals, bytes_accessed=bytes_accessed)

    # ---- raise scoped VMEM limit only when the default would be tight (v5e: 16 MiB) ----
    vmem_est = (
        2 * tb * (2 * d_p + 4 * l_p + recon_bytes * d_p + 8 * l_p)   # double-buffered tiles
        + 2 * weight_bytes                                            # resident weights (2 bufs)
        + 4 * tb * (h1_p + 2 * h2_p + 2 * l_p + d_p)                  # f32 intermediates
    )
    compiler_kwargs = dict(dimension_semantics=("parallel",))
    if vmem_est > 12 * 1024 * 1024:
        compiler_kwargs["vmem_limit_bytes"] = int(min(2 * vmem_est, 64 * 1024 * 1024))

    recon_p, mu_p, logvar_p = pl.pallas_call(
        vae_kernel,
        grid=grid,
        in_specs=in_specs,
        out_specs=out_specs,
        out_shape=(
            jax.ShapeDtypeStruct((b_p, d_p), recon_dtype),
            jax.ShapeDtypeStruct((b_p, l_p), jnp.float32),
            jax.ShapeDtypeStruct((b_p, l_p), jnp.float32),
        ),
        cost_estimate=cost,
        compiler_params=pltpu.CompilerParams(**compiler_kwargs),
    )(
        x_p, eps_p,
        w["w_e1"], w["b_e1"], w["w_e2"], w["b_e2"],
        w["w_heads"], w["b_heads"], w["w_di"], w["b_di"], w["w_do"], w["b_do"],
    )

    # strip padding (fused into the same jit)
    recon = recon_p[:b, :input_dim]
    mu = mu_p[:b, :latent_dim]
    logvar = logvar_p[:b, :latent_dim]
    return recon, mu, logvar


def vae_forward(x, eps, packed: PackedVAEParams, *, block_batch=None,
                recon_dtype=jnp.float32):
    """x: [B, C, H, W] float32. eps: [B, latent_dim] standard-normal noise.

    Returns (recon [B, input_dim], mu [B, latent_dim], logvar [B, latent_dim]).
    Set recon_dtype=jnp.bfloat16 to halve recon writeback traffic if acceptable.
    """
    return _vae_forward_impl(
        x, eps, packed.arrays,
        input_dim=packed.input_dim, latent_dim=packed.latent_dim,
        block_batch=block_batch, recon_dtype=recon_dtype)


# ---------------------------- params / reference ----------------------------


def init_params(key, input_dim, hidden_dims, latent_dim):
    """Deterministic synthetic parameters. Linear weights stored as (in, out)."""
    def linear(k, fan_in, fan_out):
        kw, kb = jax.random.split(k)
        scale = 1.0 / jnp.sqrt(fan_in)
        w = jax.random.uniform(kw, (fan_in, fan_out), jnp.float32, -scale, scale)
        b = jax.random.uniform(kb, (1, fan_out), jnp.float32, -scale, scale)
        return w, b

    keys = jax.random.split(key, 6)
    w_e1, b_e1 = linear(keys[0], input_dim, hidden_dims[0])
    w_e2, b_e2 = linear(keys[1], hidden_dims[0], hidden_dims[1])
    w_mu, b_mu = linear(keys[2], hidden_dims[1], latent_dim)
    w_lv, b_lv = linear(keys[3], hidden_dims[1], latent_dim)
    w_di, b_di = linear(keys[4], latent_dim, hidden_dims[1])
    w_do, b_do = linear(keys[5], hidden_dims[1], input_dim)
    return dict(
        w_e1=w_e1, b_e1=b_e1, w_e2=w_e2, b_e2=b_e2,
        w_mu=w_mu, b_mu=b_mu, w_lv=w_lv, b_lv=b_lv,
        w_di=w_di, b_di=b_di, w_do=w_do, b_do=b_do,
    )


def vae_reference(x, eps, params, input_dim):
    """Pure-JAX f32 reference mirroring the PyTorch forward."""
    xf = x.reshape(-1, input_dim)
    h = jnp.maximum(xf @ params["w_e1"] + params["b_e1"], 0.0)
    h = jnp.maximum(h @ params["w_e2"] + params["b_e2"], 0.0)
    mu = h @ params["w_mu"] + params["b_mu"]
    logvar = h @ params["w_lv"] + params["b_lv"]
    z = mu + eps * jnp.exp(0.5 * logvar)
    hd = jnp.maximum(z @ params["w_di"] + params["b_di"], 0.0)
    recon = jax.nn.sigmoid(hd @ params["w_do"] + params["b_do"])
    return recon, mu, logvar


if __name__ == "__main__":
    # Small shapes consistent with the module: x is an NCHW image batch that
    # flattens to input_dim features per sample.
    B, C, H, W = 2, 1, 8, 8          # -> input_dim = 64
    input_dim = C * H * W
    hidden_dims = [32, 16]
    latent_dim = 8

    root = jax.random.PRNGKey(0)
    k_x, k_eps, k_p = jax.random.split(root, 3)

    x = jax.random.uniform(k_x, (B, C, H, W), jnp.float32)
    eps = jax.random.normal(k_eps, (B, latent_dim), jnp.float32)  # torch.randn_like(std)
    params = init_params(k_p, input_dim, hidden_dims, latent_dim)

    packed = pack_params(params)                      # weight prep happens ONCE here
    recon, mu, logvar = vae_forward(x, eps, packed)
    jax.block_until_ready((recon, mu, logvar))

    assert recon.shape == (B, input_dim)
    assert mu.shape == (B, latent_dim)
    assert logvar.shape == (B, latent_dim)
    assert bool(jnp.all(jnp.isfinite(recon)))

    # tolerance-gated check vs f32 reference (kernel uses bf16 MXU operands)
    r_ref, mu_ref, lv_ref = vae_reference(x, eps, params, input_dim)
    assert bool(jnp.allclose(recon, r_ref, atol=5e-2, rtol=5e-2))
    assert bool(jnp.allclose(mu, mu_ref, atol=5e-2, rtol=5e-2))
    assert bool(jnp.allclose(logvar, lv_ref, atol=5e-2, rtol=5e-2))

    print("KERNEL_OK")
</pallas_src>

<mosaic_0001>
module attributes {stable_mosaic.version = 11 : i64} {
  func.func @vae_kernel(%arg0: i32, %arg1: memref<16x128xbf16, #tpu.memory_space<vmem>>, %arg2: memref<16x128xf32, #tpu.memory_space<vmem>>, %arg3: memref<128x128xbf16, #tpu.memory_space<vmem>>, %arg4: memref<1x128xf32, #tpu.memory_space<vmem>>, %arg5: memref<128x128xbf16, #tpu.memory_space<vmem>>, %arg6: memref<1x128xf32, #tpu.memory_space<vmem>>, %arg7: memref<128x256xbf16, #tpu.memory_space<vmem>>, %arg8: memref<1x256xf32, #tpu.memory_space<vmem>>, %arg9: memref<128x128xbf16, #tpu.memory_space<vmem>>, %arg10: memref<1x128xf32, #tpu.memory_space<vmem>>, %arg11: memref<128x128xbf16, #tpu.memory_space<vmem>>, %arg12: memref<1x128xf32, #tpu.memory_space<vmem>>, %arg13: memref<16x128xf32, #tpu.memory_space<vmem>>, %arg14: memref<16x128xf32, #tpu.memory_space<vmem>>, %arg15: memref<16x128xf32, #tpu.memory_space<vmem>>) attributes {dimension_semantics = [#tpu.dimension_semantics<parallel>], iteration_bounds = array<i64: 1>, scalar_prefetch = 0 : i64, scratch_operands = 0 : i64, tpu.core_type = #tpu.core_type<tc>, window_params = [{transform_indices = @transform_0, window_bounds = array<i64: 16, 128>}, {transform_indices = @transform_1, window_bounds = array<i64: 16, 128>}, {pipeline_mode = #tpu.pipeline_mode<synchronous>, transform_indices = @transform_2, window_bounds = array<i64: 128, 128>}, {pipeline_mode = #tpu.pipeline_mode<synchronous>, transform_indices = @transform_3, window_bounds = array<i64: 1, 128>}, {pipeline_mode = #tpu.pipeline_mode<synchronous>, transform_indices = @transform_4, window_bounds = array<i64: 128, 128>}, {pipeline_mode = #tpu.pipeline_mode<synchronous>, transform_indices = @transform_5, window_bounds = array<i64: 1, 128>}, {pipeline_mode = #tpu.pipeline_mode<synchronous>, transform_indices = @transform_6, window_bounds = array<i64: 128, 256>}, {pipeline_mode = #tpu.pipeline_mode<synchronous>, transform_indices = @transform_7, window_bounds = array<i64: 1, 256>}, {pipeline_mode = #tpu.pipeline_mode<synchronous>, transform_indices = @transform_8, window_bounds = array<i64: 128, 128>}, {pipeline_mode = #tpu.pipeline_mode<synchronous>, transform_indices = @transform_9, window_bounds = array<i64: 1, 128>}, {pipeline_mode = #tpu.pipeline_mode<synchronous>, transform_indices = @transform_10, window_bounds = array<i64: 128, 128>}, {pipeline_mode = #tpu.pipeline_mode<synchronous>, transform_indices = @transform_11, window_bounds = array<i64: 1, 128>}, {transform_indices = @transform_12, window_bounds = array<i64: 16, 128>}, {transform_indices = @transform_13, window_bounds = array<i64: 16, 128>}, {transform_indices = @transform_14, window_bounds = array<i64: 16, 128>}]} {
    %c0 = arith.constant 0 : index
    %c0_0 = arith.constant 0 : index
    %0 = vector.load %arg1[%c0, %c0_0] : memref<16x128xbf16, #tpu.memory_space<vmem>>, vector<16x128xbf16>
    %c0_1 = arith.constant 0 : index
    %c0_2 = arith.constant 0 : index
    %1 = vector.load %arg3[%c0_1, %c0_2] : memref<128x128xbf16, #tpu.memory_space<vmem>>, vector<128x128xbf16>
    %cst = arith.constant dense<0.000000e+00> : vector<16x128xf32>
    %2 = tpu.matmul %0, %1, %cst {dimension_numbers = #tpu.dot_dimension_numbers<[1], [0], [0], [1], [0, 0, 1, 1], [], []>} : vector<16x128xbf16>, vector<128x128xbf16>, vector<16x128xf32> -> vector<16x128xf32>
    %c0_3 = arith.constant 0 : index
    %c0_4 = arith.constant 0 : index
    %3 = vector.load %arg4[%c0_3, %c0_4] : memref<1x128xf32, #tpu.memory_space<vmem>>, vector<1x128xf32>
    %4 = vector.broadcast %3 : vector<1x128xf32> to vector<16x128xf32>
    %5 = arith.addf %2, %4 : vector<16x128xf32>
    %cst_5 = arith.constant 0.000000e+00 : f32
    %6 = vector.broadcast %cst_5 : f32 to vector<16x128xf32>
    %7 = arith.maximumf %5, %6 : vector<16x128xf32>
    %8 = arith.truncf %7 : vector<16x128xf32> to vector<16x128xbf16>
    %c0_6 = arith.constant 0 : index
    %c0_7 = arith.constant 0 : index
    %9 = vector.load %arg5[%c0_6, %c0_7] : memref<128x128xbf16, #tpu.memory_space<vmem>>, vector<128x128xbf16>
    %cst_8 = arith.constant dense<0.000000e+00> : vector<16x128xf32>
    %10 = tpu.matmul %8, %9, %cst_8 {dimension_numbers = #tpu.dot_dimension_numbers<[1], [0], [0], [1], [0, 0, 1, 1], [], []>} : vector<16x128xbf16>, vector<128x128xbf16>, vector<16x128xf32> -> vector<16x128xf32>
    %c0_9 = arith.constant 0 : index
    %c0_10 = arith.constant 0 : index
    %11 = vector.load %arg6[%c0_9, %c0_10] : memref<1x128xf32, #tpu.memory_space<vmem>>, vector<1x128xf32>
    %12 = vector.broadcast %11 : vector<1x128xf32> to vector<16x128xf32>
    %13 = arith.addf %10, %12 : vector<16x128xf32>
    %cst_11 = arith.constant 0.000000e+00 : f32
    %14 = vector.broadcast %cst_11 : f32 to vector<16x128xf32>
    %15 = arith.maximumf %13, %14 : vector<16x128xf32>
    %16 = arith.truncf %15 : vector<16x128xf32> to vector<16x128xbf16>
    %c0_12 = arith.constant 0 : index
    %c0_13 = arith.constant 0 : index
    %17 = vector.load %arg7[%c0_12, %c0_13] : memref<128x256xbf16, #tpu.memory_space<vmem>>, vector<128x256xbf16>
    %cst_14 = arith.constant dense<0.000000e+00> : vector<16x256xf32>
    %18 = tpu.matmul %16, %17, %cst_14 {dimension_numbers = #tpu.dot_dimension_numbers<[1], [0], [0], [1], [0, 0, 1, 1], [], []>} : vector<16x128xbf16>, vector<128x256xbf16>, vector<16x256xf32> -> vector<16x256xf32>
    %c0_15 = arith.constant 0 : index
    %c0_16 = arith.constant 0 : index
    %19 = vector.load %arg8[%c0_15, %c0_16] : memref<1x256xf32, #tpu.memory_space<vmem>>, vector<1x256xf32>
    %20 = vector.broadcast %19 : vector<1x256xf32> to vector<16x256xf32>
    %21 = arith.addf %18, %20 : vector<16x256xf32>
    %22 = vector.extract_strided_slice %21 {offsets = [0, 0], sizes = [16, 128], strides = [1, 1]} : vector<16x256xf32> to vector<16x128xf32>
    %23 = vector.extract_strided_slice %21 {offsets = [0, 128], sizes = [16, 128], strides = [1, 1]} : vector<16x256xf32> to vector<16x128xf32>
    %cst_17 = arith.constant 5.000000e-01 : f32
    %24 = vector.broadcast %cst_17 : f32 to vector<16x128xf32>
    %25 = arith.mulf %24, %23 : vector<16x128xf32>
    %26 = math.exp %25 : vector<16x128xf32>
    %c0_18 = arith.constant 0 : index
    %c0_19 = arith.constant 0 : index
    %27 = vector.load %arg2[%c0_18, %c0_19] : memref<16x128xf32, #tpu.memory_space<vmem>>, vector<16x128xf32>
    %28 = arith.mulf %27, %26 : vector<16x128xf32>
    %29 = arith.addf %22, %28 : vector<16x128xf32>
    %30 = arith.truncf %29 : vector<16x128xf32> to vector<16x128xbf16>
    %c0_20 = arith.constant 0 : index
    %c0_21 = arith.constant 0 : index
    %31 = vector.load %arg9[%c0_20, %c0_21] : memref<128x128xbf16, #tpu.memory_space<vmem>>, vector<128x128xbf16>
    %cst_22 = arith.constant dense<0.000000e+00> : vector<16x128xf32>
    %32 = tpu.matmul %30, %31, %cst_22 {dimension_numbers = #tpu.dot_dimension_numbers<[1], [0], [0], [1], [0, 0, 1, 1], [], []>} : vector<16x128xbf16>, vector<128x128xbf16>, vector<16x128xf32> -> vector<16x128xf32>
    %c0_23 = arith.constant 0 : index
    %c0_24 = arith.constant 0 : index
    %33 = vector.load %arg10[%c0_23, %c0_24] : memref<1x128xf32, #tpu.memory_space<vmem>>, vector<1x128xf32>
    %34 = vector.broadcast %33 : vector<1x128xf32> to vector<16x128xf32>
    %35 = arith.addf %32, %34 : vector<16x128xf32>
    %cst_25 = arith.constant 0.000000e+00 : f32
    %36 = vector.broadcast %cst_25 : f32 to vector<16x128xf32>
    %37 = arith.maximumf %35, %36 : vector<16x128xf32>
    %38 = arith.truncf %37 : vector<16x128xf32> to vector<16x128xbf16>
    %c0_26 = arith.constant 0 : index
    %c0_27 = arith.constant 0 : index
    %39 = vector.load %arg11[%c0_26, %c0_27] : memref<128x128xbf16, #tpu.memory_space<vmem>>, vector<128x128xbf16>
    %cst_28 = arith.constant dense<0.000000e+00> : vector<16x128xf32>
    %40 = tpu.matmul %38, %39, %cst_28 {dimension_numbers = #tpu.dot_dimension_numbers<[1], [0], [0], [1], [0, 0, 1, 1], [], []>} : vector<16x128xbf16>, vector<128x128xbf16>, vector<16x128xf32> -> vector<16x128xf32>
    %c0_29 = arith.constant 0 : index
    %c0_30 = arith.constant 0 : index
    %41 = vector.load %arg12[%c0_29, %c0_30] : memref<1x128xf32, #tpu.memory_space<vmem>>, vector<1x128xf32>
    %42 = vector.broadcast %41 : vector<1x128xf32> to vector<16x128xf32>
    %43 = arith.addf %40, %42 : vector<16x128xf32>
    %44 = arith.negf %43 : vector<16x128xf32>
    %45 = math.exp %44 : vector<16x128xf32>
    %cst_31 = arith.constant 1.000000e+00 : f32
    %46 = vector.broadcast %cst_31 : f32 to vector<16x128xf32>
    %47 = arith.addf %46, %45 : vector<16x128xf32>
    %48 = arith.divf %46, %47 : vector<16x128xf32>
    %c0_32 = arith.constant 0 : index
    %c0_33 = arith.constant 0 : index
    %49 = vector.load %arg13[%c0_32, %c0_33] : memref<16x128xf32, #tpu.memory_space<vmem>>, vector<16x128xf32>
    tpu.vector_store %arg13[%c0_32, %c0_33], %48 {strides = array<i32>} : memref<16x128xf32, #tpu.memory_space<vmem>>, vector<16x128xf32>,
    %c0_34 = arith.constant 0 : index
    %c0_35 = arith.constant 0 : index
    %50 = vector.load %arg14[%c0_34, %c0_35] : memref<16x128xf32, #tpu.memory_space<vmem>>, vector<16x128xf32>
    tpu.vector_store %arg14[%c0_34, %c0_35], %22 {strides = array<i32>} : memref<16x128xf32, #tpu.memory_space<vmem>>, vector<16x128xf32>,
    %c0_36 = arith.constant 0 : index
    %c0_37 = arith.constant 0 : index
    %51 = vector.load %arg15[%c0_36, %c0_37] : memref<16x128xf32, #tpu.memory_space<vmem>>, vector<16x128xf32>
    tpu.vector_store %arg15[%c0_36, %c0_37], %23 {strides = array<i32>} : memref<16x128xf32, #tpu.memory_space<vmem>>, vector<16x128xf32>,
    return
  }
  func.func @transform_0(%arg0: i32) -> (i32, i32) {
    %c0_i32 = arith.constant 0 : i32
    %c0_i32_0 = arith.constant 0 : i32
    return %arg0, %c0_i32 : i32, i32
  }
  func.func @transform_1(%arg0: i32) -> (i32, i32) {
    %c0_i32 = arith.constant 0 : i32
    %c0_i32_0 = arith.constant 0 : i32
    return %arg0, %c0_i32 : i32, i32
  }
  func.func @transform_2(%arg0: i32) -> (i32, i32) {
    %c0_i32 = arith.constant 0 : i32
    %c0_i32_0 = arith.constant 0 : i32
    %c0_i32_1 = arith.constant 0 : i32
    return %c0_i32, %c0_i32_0 : i32, i32
  }
  func.func @transform_3(%arg0: i32) -> (i32, i32) {
    %c0_i32 = arith.constant 0 : i32
    %c0_i32_0 = arith.constant 0 : i32
    %c0_i32_1 = arith.constant 0 : i32
    return %c0_i32, %c0_i32_0 : i32, i32
  }
  func.func @transform_4(%arg0: i32) -> (i32, i32) {
    %c0_i32 = arith.constant 0 : i32
    %c0_i32_0 = arith.constant 0 : i32
    %c0_i32_1 = arith.constant 0 : i32
    return %c0_i32, %c0_i32_0 : i32, i32
  }
  func.func @transform_5(%arg0: i32) -> (i32, i32) {
    %c0_i32 = arith.constant 0 : i32
    %c0_i32_0 = arith.constant 0 : i32
    %c0_i32_1 = arith.constant 0 : i32
    return %c0_i32, %c0_i32_0 : i32, i32
  }
  func.func @transform_6(%arg0: i32) -> (i32, i32) {
    %c0_i32 = arith.constant 0 : i32
    %c0_i32_0 = arith.constant 0 : i32
    %c0_i32_1 = arith.constant 0 : i32
    return %c0_i32, %c0_i32_0 : i32, i32
  }
  func.func @transform_7(%arg0: i32) -> (i32, i32) {
    %c0_i32 = arith.constant 0 : i32
    %c0_i32_0 = arith.constant 0 : i32
    %c0_i32_1 = arith.constant 0 : i32
    return %c0_i32, %c0_i32_0 : i32, i32
  }
  func.func @transform_8(%arg0: i32) -> (i32, i32) {
    %c0_i32 = arith.constant 0 : i32
    %c0_i32_0 = arith.constant 0 : i32
    %c0_i32_1 = arith.constant 0 : i32
    return %c0_i32, %c0_i32_0 : i32, i32
  }
  func.func @transform_9(%arg0: i32) -> (i32, i32) {
    %c0_i32 = arith.constant 0 : i32
    %c0_i32_0 = arith.constant 0 : i32
    %c0_i32_1 = arith.constant 0 : i32
    return %c0_i32, %c0_i32_0 : i32, i32
  }
  func.func @transform_10(%arg0: i32) -> (i32, i32) {
    %c0_i32 = arith.constant 0 : i32
    %c0_i32_0 = arith.constant 0 : i32
    %c0_i32_1 = arith.constant 0 : i32
    return %c0_i32, %c0_i32_0 : i32, i32
  }
  func.func @transform_11(%arg0: i32) -> (i32, i32) {
    %c0_i32 = arith.constant 0 : i32
    %c0_i32_0 = arith.constant 0 : i32
    %c0_i32_1 = arith.constant 0 : i32
    return %c0_i32, %c0_i32_0 : i32, i32
  }
  func.func @transform_12(%arg0: i32) -> (i32, i32) {
    %c0_i32 = arith.constant 0 : i32
    %c0_i32_0 = arith.constant 0 : i32
    return %arg0, %c0_i32 : i32, i32
  }
  func.func @transform_13(%arg0: i32) -> (i32, i32) {
    %c0_i32 = arith.constant 0 : i32
    %c0_i32_0 = arith.constant 0 : i32
    return %arg0, %c0_i32 : i32, i32
  }
  func.func @transform_14(%arg0: i32) -> (i32, i32) {
    %c0_i32 = arith.constant 0 : i32
    %c0_i32_0 = arith.constant 0 : i32
    return %arg0, %c0_i32 : i32, i32
  }
}

</mosaic_0001>

<bundles_post_ra>
// kernel: _vae_forward_impl.1
= control target key start
LH: loop header
LB: loop body
LE: loop exit
PB: predicated region body
PF: predicated region fallthrough
CT: control target
= control target key end

     0   :  { %20 = vsyncpa [#allocation3], 0  ;;  %s1303_s0 = inlined_call_operand.vmem [shape: bf16[16,128], index: 0, kind: input, shape index: {}]   ;;  %s1304_s1 = inlined_call_operand.vmem [shape: f32[16,128], index: 1, kind: input, shape index: {}]   ;;  %s1305_s2 = inlined_call_operand.vmem [shape: bf16[128,128], index: 2, kind: input, shape index: {}]   ;;  %s1306_s3 = inlined_call_operand.vmem [shape: f32[1,128], index: 3, kind: input, shape index: {}]   ;;  %s1307_s4 = inlined_call_operand.hbm [shape: bf16[128,128], index: 4, kind: input, shape index: {}]   ;;  %s1308_s5 = inlined_call_operand.vmem [shape: f32[1,128], index: 5, kind: input, shape index: {}]   ;;  %s1309_s6 = inlined_call_operand.hbm [shape: bf16[128,256], index: 6, kind: input, shape index: {}]   ;;  %s1310_s7 = inlined_call_operand.vmem [shape: f32[1,256], index: 7, kind: input, shape index: {}]   ;;  %s1311_s8 = inlined_call_operand.hbm [shape: bf16[128,128], index: 8, kind: input, shape index: {}]   ;;  %s1312_s9 = inlined_call_operand.vmem [shape: f32[1,128], index: 9, kind: input, shape index: {}]   ;;  %s1313_s10 = inlined_call_operand.hbm [shape: bf16[128,128], index: 10, kind: input, shape index: {}]   ;;  %s1314_s11 = inlined_call_operand.vmem [shape: f32[1,128], index: 11, kind: input, shape index: {}]   ;;  %s1315_s12 = inlined_call_operand.vmem [shape: f32[16,128], index: 12, kind: output, shape index: {0}]   ;;  %s1316_s13 = inlined_call_operand.vmem [shape: f32[16,128], index: 13, kind: output, shape index: {1}]   ;;  %s1317_s14 = inlined_call_operand.vmem [shape: f32[16,128], index: 14, kind: output, shape index: {2}]  }
   0x1   :  { %21 = vsyncpa [#allocation5], 0 }
   0x2   :  { %22 = vsyncpa [#allocation8], 0  ;;  %s1099_s29 = smov [#allocation4]  }
   0x3   :  { %s50_s30 = sshll.u32 %s1099_s29, 4  ;;  %s51_s30 = int_to_ptr.vmem [resolvable:$true] %s50_s30 }
   0x4   :  { %s1021_s15 = scalar_lea.vmem %s51_s30, 2048  ;;  %p1026_p1 = scmp.lt.s32.totalorder %s51_s30, %s51_s30 }
   0x5   :  { %p1022_p0 = scmp.ne.s32.totalorder %s51_s30, %s1021_s15  ;;  %p1027_p2 = scmp.lt.s32.totalorder %s1021_s15, %s1021_s15 }
   0x7   :  { %p1028_p3 = por %p1027_p2, %p1026_p1 }
   0x9   :  { %p1029_p4 = pnand %p1028_p3, %p1022_p0 }
   0xb   :  { %1032 = shalt.err (!%p1029_p4)
}
   0xc   :  { %s1100_s16 = smov 128   ;;  %s1101_s17 = smov 8  }
   0xd   :  { %56 = dma.hbm_to_vmem [thread:$0]  %s1309_s6, 2048, %s51_s30, [#allocation5], %s1100_s16, %s1100_s16, %s1101_s17  }
   0xe   :  { %s1102_s20 = smov [#allocation2]  }
   0xf   :  { %s36_s21 = sshll.u32 %s1102_s20, 4  ;;  %s37_s21 = int_to_ptr.vmem [resolvable:$true] %s36_s21 }
  0x10   :  { %s1041_s22 = scalar_lea.vmem %s37_s21, 1024  ;;  %p1046_p6 = scmp.lt.s32.totalorder %s37_s21, %s37_s21 }
  0x11   :  { %p1042_p5 = scmp.ne.s32.totalorder %s37_s21, %s1041_s22  ;;  %p1047_p7 = scmp.lt.s32.totalorder %s1041_s22, %s1041_s22 }
  0x13   :  { %p1048_p8 = por %p1047_p7, %p1046_p6 }
  0x15   :  { %p1049_p9 = pnand %p1048_p8, %p1042_p5 }
  0x17   :  { %1052 = shalt.err (!%p1049_p9)
}
  0x18   :  { %s1103_s23 = smov 64   ;;  %s1104_s24 = smov 4  }
  0x19   :  { %42 = dma.hbm_to_vmem [thread:$0]  %s1307_s4, 1024, %s37_s21, [#allocation3], %s1103_s23, %s1103_s23, %s1104_s24  }
  0x1a   :  { %s1105_s27 = smov [#allocation6]   ;;  %s1106_s29 = smov [#allocation7]  }
  0x1b   :  { %s64_s28 = sshll.u32 %s1105_s27, 4  ;;  %s78_s6 = sshll.u32 %s1106_s29, 4  ;;  %s65_s28 = int_to_ptr.vmem [resolvable:$true] %s64_s28  ;;  %s79_s6 = int_to_ptr.vmem [resolvable:$true] %s78_s6 }
  0x1c   :  { %s1061_s30 = scalar_lea.vmem %s65_s28, 1024  ;;  %p1066_p11 = scmp.lt.s32.totalorder %s65_s28, %s65_s28 }
  0x1d   :  { %p1062_p10 = scmp.ne.s32.totalorder %s65_s28, %s1061_s30  ;;  %p1067_p12 = scmp.lt.s32.totalorder %s1061_s30, %s1061_s30 }
  0x1f   :  { %p1068_p13 = por %p1067_p12, %p1066_p11 }
  0x21   :  { %p1069_p0 = pnand %p1068_p13, %p1062_p10 }
  0x23   :  { %1072 = shalt.err (!%p1069_p0)
}
  0x24   :  { %70 = dma.hbm_to_vmem [thread:$0]  %s1311_s8, 1024, %s65_s28, [#allocation5], %s1103_s23, %s1103_s23, %s1104_s24  }
  0x25   :  { %s1081_s17 = scalar_lea.vmem %s79_s6, 1024  ;;  %p1086_p2 = scmp.lt.s32.totalorder %s79_s6, %s79_s6 }
  0x26   :  { %p1082_p1 = scmp.ne.s32.totalorder %s79_s6, %s1081_s17  ;;  %p1087_p3 = scmp.lt.s32.totalorder %s1081_s17, %s1081_s17 }
  0x28   :  { %p1088_p4 = por %p1087_p3, %p1086_p2 }
  0x2a   :  { %p1089_p5 = pnand %p1088_p4, %p1082_p1 }
  0x2c   :  { %1092 = shalt.err (!%p1089_p5)
}
  0x2d   :  { %84 = dma.hbm_to_vmem [thread:$0]  %s1313_s10, 1024, %s79_s6, [#allocation8], %s1103_s23, %s1103_s23, %s1104_s24  }
  0x2e   :  { %1093 = dma.done.wait [#allocation3], 1024  }
  0x2f   :  { %1094 = vsyncadd [#allocation3], 4294966272 }
  0x30   :  { %1095 = dma.done.wait [#allocation5], 3072  }
  0x31   :  { %1096 = vsyncadd [#allocation5], 4294964224 }
  0x32   :  { %1097 = dma.done.wait [#allocation8], 1024  }
  0x33   :  { %1098 = vsyncadd [#allocation8], 4294966272  ;;  %v1107_v0 = vmov 0.0   ;;  %vm1108_vm0 = vmmov 0   ;;  %v944_v1 = vld [vmem:[%s1305_s2 + $0x38] sm:$0xff]   ;;  %v945_v2 = vld [vmem:[%s1305_s2 + $0x30] sm:$0xff]  }
  0x34   :  { %853 = vmatprep.subr.bf16.mxu0 %v1107_v0  ;;  %869 = vmatprep.mubr.msk.bf16.mxu0 %vm1108_vm0, %v1107_v0  ;;  %v946_v3 = vld [vmem:[%s1305_s2 + $0x28] sm:$0xff]   ;;  %v953_v4 = vld [vmem:[#allocation2 + $0x38] sm:$0xff]   ;;  %v947_v5 = vld [vmem:[%s1305_s2 + $0x20] sm:$0xff]   ;;  %v1109_v44 = vmov 0  }
  0x35   :  { %873 = vmatprep.subr.bf16.mxu1 %v1107_v0  ;;  %889 = vmatprep.mubr.msk.bf16.mxu1 %vm1108_vm0, %v1107_v0  ;;  %v954_v6 = vld [vmem:[#allocation2 + $0x30] sm:$0xff]   ;;  %v948_v7 = vld [vmem:[%s1305_s2 + $0x18] sm:$0xff]   ;;  %v955_v8 = vld [vmem:[#allocation2 + $0x28] sm:$0xff]  }
  0x36   :  { %854 = vmatpush3.bf16.msra.mxu0 %v944_v1  ;;  %874 = vmatpush3.bf16.msra.mxu1 %v953_v4  ;;  %v949_v9 = vld [vmem:[%s1305_s2 + $0x10] sm:$0xff]   ;;  %v956_v10 = vld [vmem:[#allocation2 + $0x20] sm:$0xff]   ;;  %v950_v11 = vld [vmem:[%s1305_s2 + $0x8] sm:$0xff]  }
  0x37   :  { %855 = vmatprep.subr.bf16.mxu0 %v1107_v0  ;;  %875 = vmatprep.subr.bf16.mxu1 %v1107_v0  ;;  %v957_v12 = vld [vmem:[#allocation2 + $0x18] sm:$0xff]   ;;  %v951_v13 = vld [vmem:[%s1305_s2] sm:$0xff]   ;;  %v958_v15 = vld [vmem:[#allocation2 + $0x10] sm:$0xff]  }
  0x38   :  { %v952_v14 = vld [vmem:[%s1303_s0] sm:$0xff]   ;;  %v959_v16 = vld [vmem:[#allocation2 + $0x8] sm:$0xff]   ;;  %v961_v18 = vld [vmem:[#allocation4 + $0x70] ss:$8 sps:$4 sm:$0xff]  }
  0x39   :  { %v960_v17 = vld [vmem:[#allocation2] sm:$0xff]   ;;  %v963_v19 = vld [vmem:[#allocation4 + $0x74] ss:$8 sps:$4 sm:$0xff]   ;;  %v967_v23 = vld [vmem:[#allocation4 + $0x50] ss:$8 sps:$4 sm:$0xff]  }
  0x3a   :  { %856 = vmatpush3.bf16.msra.mxu0 %v945_v2  ;;  %876 = vmatpush3.bf16.msra.mxu1 %v954_v6  ;;  %v966_v20 = vld [vmem:[#allocation4 + $0x64] ss:$8 sps:$4 sm:$0xff]   ;;  %v964_v21 = vld [vmem:[#allocation4 + $0x60] ss:$8 sps:$4 sm:$0xff]   ;;  %v969_v22 = vld [vmem:[#allocation4 + $0x54] ss:$8 sps:$4 sm:$0xff]  }
  0x3b   :  { %857 = vmatprep.subr.bf16.mxu0 %v1107_v0  ;;  %877 = vmatprep.subr.bf16.mxu1 %v1107_v0  ;;  %v972_v24 = vld [vmem:[#allocation4 + $0x44] ss:$8 sps:$4 sm:$0xff]   ;;  %v970_v25 = vld [vmem:[#allocation4 + $0x40] ss:$8 sps:$4 sm:$0xff]   ;;  %v975_v26 = vld [vmem:[#allocation4 + $0x34] ss:$8 sps:$4 sm:$0xff]  }
  0x3c   :  { %v973_v27 = vld [vmem:[#allocation4 + $0x30] ss:$8 sps:$4 sm:$0xff]   ;;  %v978_v28 = vld [vmem:[#allocation4 + $0x24] ss:$8 sps:$4 sm:$0xff]   ;;  %v976_v29 = vld [vmem:[#allocation4 + $0x20] ss:$8 sps:$4 sm:$0xff]  }
  0x3d   :  { %v762_v30 = vld [vmem:[%s1306_s3] ss:$0 sm:$0xff]  ;;  %v981_v40 = vld [vmem:[#allocation4 + $0x14] ss:$8 sps:$4 sm:$0xff]   ;;  %v979_v41 = vld [vmem:[#allocation4 + $0x10] ss:$8 sps:$4 sm:$0xff]  }
  0x3e   :  { %858 = vmatpush3.bf16.msra.mxu0 %v946_v3  ;;  %878 = vmatpush3.bf16.msra.mxu1 %v955_v8  ;;  %v984_v42 = vld [vmem:[#allocation4 + $0x4] ss:$8 sps:$4 sm:$0xff]   ;;  %v982_v43 = vld [vmem:[#allocation4] ss:$8 sps:$4 sm:$0xff]   ;;  %v985_v55 = vld [vmem:[#allocation6 + $0x38] sm:$0xff]  }
  0x3f   :  { %859 = vmatprep.subr.bf16.mxu0 %v1107_v0  ;;  %879 = vmatprep.subr.bf16.mxu1 %v1107_v0  ;;  %v772_v45 = vld [vmem:[%s1308_s5] ss:$0 sm:$0xff]  ;;  %v986_v56 = vld [vmem:[#allocation6 + $0x30] sm:$0xff]   ;;  %v987_v57 = vld [vmem:[#allocation6 + $0x28] sm:$0xff]  }
  0x40   :  { %v988_v58 = vld [vmem:[#allocation6 + $0x20] sm:$0xff]   ;;  %v989_v59 = vld [vmem:[#allocation6 + $0x18] sm:$0xff]   ;;  %v990_v60 = vld [vmem:[#allocation6 + $0x10] sm:$0xff]  }
  0x41   :  { %v991_v61 = vld [vmem:[#allocation6 + $0x8] sm:$0xff]   ;;  %v992_v62 = vld [vmem:[#allocation6] sm:$0xff]   ;;  %v993_v63 = vld [vmem:[#allocation7 + $0x38] sm:$0xff]  }
  0x42   :  { %860 = vmatpush3.bf16.msra.mxu0 %v947_v5  ;;  %880 = vmatpush3.bf16.msra.mxu1 %v956_v10  ;;  %v994_v1 = vld [vmem:[#allocation7 + $0x30] sm:$0xff]   ;;  %v995_v2 = vld [vmem:[#allocation7 + $0x28] sm:$0xff]   ;;  %v996_v3 = vld [vmem:[#allocation7 + $0x20] sm:$0xff]   ;;  %v356_v5 = vlaneseq }
  0x43   :  { %861 = vmatprep.subr.bf16.mxu0 %v1107_v0  ;;  %881 = vmatprep.subr.bf16.mxu1 %v1107_v0  ;;  %v997_v4 = vld [vmem:[#allocation7 + $0x18] sm:$0xff]   ;;  %v354_v8 = vld [vmem:[%s1310_s7] sm:$0x3] }
  0x44   :  { %v357_v6 = vshrl.u32 %v356_v5, 7 }
  0x46   :  { %862 = vmatpush3.bf16.msra.mxu0 %v948_v7  ;;  %882 = vmatpush3.bf16.msra.mxu1 %v957_v12  ;;  %v358_v7 = vsub.s32 0, %v357_v6 }
  0x47   :  { %863 = vmatprep.subr.bf16.mxu0 %v1107_v0  ;;  %883 = vmatprep.subr.bf16.mxu1 %v1107_v0 }
  0x48   :  { %v359_v10 = vrot.slane %v354_v8, %v358_v7 }
  0x4a   :  { %864 = vmatpush3.bf16.msra.mxu0 %v949_v9  ;;  %884 = vmatpush3.bf16.msra.mxu1 %v958_v15  ;;  %v362_v9 = vsub.s32 1, %v357_v6 }
  0x4b   :  { %865 = vmatprep.subr.bf16.mxu0 %v1107_v0  ;;  %885 = vmatprep.subr.bf16.mxu1 %v1107_v0 }
  0x4e   :  { %866 = vmatpush3.bf16.msra.mxu0 %v950_v11  ;;  %886 = vmatpush3.bf16.msra.mxu1 %v959_v16  ;;  %v363_v11 = vrot.slane %v354_v8, %v362_v9 }
  0x4f   :  { %867 = vmatprep.subr.bf16.mxu0 %v1107_v0  ;;  %887 = vmatprep.subr.bf16.mxu1 %v1107_v0 }
  0x52   :  { %868 = vmatpush3.bf16.msra.mxu0 %v951_v13  ;;  %888 = vmatpush3.bf16.msra.mxu1 %v960_v17 }
  0x53   :  { %893 = vmatprep.subr.bf16.mxu1 %v1107_v0  ;;  %446 = vmatprep.subr.bf16.mxu0 %v963_v19 }
  0x55   :  { %870 = vmatmul.mubr.bf16.vlgmr.msra.gmra.mxu0 %v952_v14 }
  0x56   :  { %447 = vmatpush1.bf16.msra.mxu0 %v961_v18  ;;  %478 = vmatprep.mubr.bf16.mxu0 %v1109_v44 }
  0x57   :  { %448 = vmatprep.subr.bf16.mxu0 %v966_v20 }
  0x5a   :  { %449 = vmatpush1.bf16.msra.mxu0 %v964_v21 }
  0x5b   :  { %450 = vmatprep.subr.bf16.mxu0 %v969_v22 }
  0x5e   :  { %451 = vmatpush1.bf16.msra.mxu0 %v967_v23 }
  0x5f   :  { %452 = vmatprep.subr.bf16.mxu0 %v972_v24 }
  0x62   :  { %453 = vmatpush1.bf16.msra.mxu0 %v970_v25  ;;  %v495_v25 = vld [vmem:[%s1304_s1] sm:$0xff] }
  0x63   :  { %454 = vmatprep.subr.bf16.mxu0 %v975_v26  ;;  %v496_v26 = vld [vmem:[%s1304_s1 + $0x8] sm:$0xff] }
  0x66   :  { %455 = vmatpush1.bf16.msra.mxu0 %v973_v27 }
  0x67   :  { %456 = vmatprep.subr.bf16.mxu0 %v978_v28 }
  0x6a   :  { %457 = vmatpush1.bf16.msra.mxu0 %v976_v29 }
  0x6b   :  { %458 = vmatprep.subr.bf16.mxu0 %v981_v40 }
  0x6e   :  { %459 = vmatpush1.bf16.msra.mxu0 %v979_v41 }
  0x6f   :  { %460 = vmatprep.subr.bf16.mxu0 %v984_v42 }
  0x72   :  { %461 = vmatpush1.bf16.msra.mxu0 %v982_v43 }
  0x73   :  { %913 = vmatprep.subr.bf16.mxu0 %v1107_v0 }
 0x115   :  { %v213_v31 = vpop.f32.mrf.mxu0 }
 0x116   :  { %v214_v33 = vadd.f32 %v762_v30, %v213_v31 }
 0x117   :  { %v871_v32 = vpop.f32.mrf.mxu0 }
 0x118   :  { %v220_v37 = vmax.f32 %v214_v33, 0.0  ;;  %v998_v33 = vld [vmem:[#allocation7 + $0x10] sm:$0xff]  }
 0x119   :  { %v216_v34 = vpop.f32.mrf.mxu0 }
 0x11a   :  { %v217_v35 = vadd.f32 %v762_v30, %v216_v34  ;;  %v999_v34 = vld [vmem:[#allocation7 + $0x8] sm:$0xff]  }
 0x11b   :  { %v872_v36 = vpop.f32.mrf.mxu0 }
 0x11c   :  { %v221_v38 = vmax.f32 %v217_v35, 0.0  ;;  %v1000_v35 = vld [vmem:[#allocation7] sm:$0xff]  }
 0x11d   :  { %v797_v36 = vld [vmem:[%s1312_s9] ss:$0 sm:$0xff] }
 0x11e   :  { %v222_v39 = vpack.c.bf16 %v221_v38, %v220_v37 }
 0x120   :  { %890 = vmatmul.mubr.bf16.vlgmr.msra.gmra.mxu1 %v222_v39 }
 0x121   :  { %909 = vmatprep.mubr.msk.bf16.mxu1 %vm1108_vm0, %v1107_v0  ;;  %894 = vmatpush3.bf16.msra.mxu1 %v985_v55 }
 0x122   :  { %895 = vmatprep.subr.bf16.mxu1 %v1107_v0 }
 0x125   :  { %896 = vmatpush3.bf16.msra.mxu1 %v986_v56 }
 0x126   :  { %897 = vmatprep.subr.bf16.mxu1 %v1107_v0 }
 0x129   :  { %898 = vmatpush3.bf16.msra.mxu1 %v987_v57 }
 0x12a   :  { %899 = vmatprep.subr.bf16.mxu1 %v1107_v0 }
 0x12d   :  { %900 = vmatpush3.bf16.msra.mxu1 %v988_v58 }
 0x12e   :  { %901 = vmatprep.subr.bf16.mxu1 %v1107_v0 }
 0x131   :  { %902 = vmatpush3.bf16.msra.mxu1 %v989_v59 }
 0x132   :  { %903 = vmatprep.subr.bf16.mxu1 %v1107_v0 }
 0x135   :  { %904 = vmatpush3.bf16.msra.mxu1 %v990_v60 }
 0x136   :  { %905 = vmatprep.subr.bf16.mxu1 %v1107_v0 }
 0x139   :  { %906 = vmatpush3.bf16.msra.mxu1 %v991_v61 }
 0x13a   :  { %907 = vmatprep.subr.bf16.mxu1 %v1107_v0 }
 0x13d   :  { %908 = vmatpush3.bf16.msra.mxu1 %v992_v62 }
 0x1e0   :  { %v328_v46 = vpop.f32.mrf.mxu1 }
 0x1e1   :  { %v329_v48 = vadd.f32 %v772_v45, %v328_v46 }
 0x1e2   :  { %v891_v47 = vpop.f32.mrf.mxu1 }
 0x1e3   :  { %v335_v52 = vmax.f32 %v329_v48, 0.0 }
 0x1e4   :  { %v331_v49 = vpop.f32.mrf.mxu1 }
 0x1e5   :  { %v332_v50 = vadd.f32 %v772_v45, %v331_v49 }
 0x1e6   :  { %v892_v51 = vpop.f32.mrf.mxu1 }
 0x1e7   :  { %v336_v53 = vmax.f32 %v332_v50, 0.0 }
 0x1e9   :  { %v337_v54 = vpack.c.bf16 %v336_v53, %v335_v52 }
 0x1eb   :  { %479 = vmatmul.mubr.bf16.vlgmr.msra.gmra.mxu0 %v337_v54 }
 0x1ec   :  { %929 = vmatprep.mubr.msk.bf16.mxu0 %vm1108_vm0, %v1107_v0  ;;  %914 = vmatpush3.bf16.msra.mxu0 %v993_v63 }
 0x1ed   :  { %915 = vmatprep.subr.bf16.mxu0 %v1107_v0 }
 0x1f0   :  { %916 = vmatpush3.bf16.msra.mxu0 %v994_v1 }
 0x1f1   :  { %917 = vmatprep.subr.bf16.mxu0 %v1107_v0 }
 0x1f4   :  { %918 = vmatpush3.bf16.msra.mxu0 %v995_v2 }
 0x1f5   :  { %919 = vmatprep.subr.bf16.mxu0 %v1107_v0 }
 0x1f8   :  { %920 = vmatpush3.bf16.msra.mxu0 %v996_v3 }
 0x1f9   :  { %921 = vmatprep.subr.bf16.mxu0 %v1107_v0 }
 0x1fc   :  { %922 = vmatpush3.bf16.msra.mxu0 %v997_v4 }
 0x1fd   :  { %923 = vmatprep.subr.bf16.mxu0 %v1107_v0 }
 0x200   :  { %924 = vmatpush3.bf16.msra.mxu0 %v998_v33 }
 0x201   :  { %925 = vmatprep.subr.bf16.mxu0 %v1107_v0 }
 0x204   :  { %926 = vmatpush3.bf16.msra.mxu0 %v999_v34 }
 0x205   :  { %927 = vmatprep.subr.bf16.mxu0 %v1107_v0  ;;  %v806_v0 = vld [vmem:[%s1314_s11] ss:$0 sm:$0xff] }
 0x208   :  { %928 = vmatpush3.bf16.msra.mxu0 %v1000_v35 }
 0x2ab   :  { %v480_v12 = vpop.f32.mrf.mxu0 }
 0x2ac   :  { %v481_v13 = vadd.f32 %v480_v12, %v359_v10 }
 0x2ad   :  { %v482_v14 = vpop.f32.mrf.mxu0 }
 0x2ae   :  { %743 = vst [vmem:[%s1316_s13] sm:$0xff] %v481_v13  ;;  %v483_v15 = vadd.f32 %v482_v14, %v363_v11 }
 0x2af   :  { %v484_v16 = vpop.f32.mrf.mxu0 }
 0x2b0   :  { %v489_v17 = vmul.f32 0.5, %v483_v15  ;;  %745 = vst [vmem:[%s1317_s14] sm:$0xff] %v483_v15  ;;  %v485_v18 = vadd.f32 %v484_v16, %v359_v10 }
 0x2b1   :  { %v486_v19 = vpop.f32.mrf.mxu0 }
 0x2b2   :  { %v491_v20 = vmul.f32 1.442695, %v489_v17  ;;  %744 = vst [vmem:[%s1316_s13 + $0x8] sm:$0xff] %v485_v18  ;;  %v487_v21 = vadd.f32 %v486_v19, %v363_v11 }
 0x2b4   :  { %1001 = vpow2.f32 %v491_v20  ;;  %v490_v22 = vmul.f32 0.5, %v487_v21  ;;  %746 = vst [vmem:[%s1317_s14 + $0x8] sm:$0xff] %v487_v21 }
 0x2b6   :  { %v493_v23 = vmul.f32 1.442695, %v490_v22 }
 0x2b8   :  { %1003 = vpow2.f32 %v493_v23 }
 0x2c1   :  { %v1002_v24 = vpop.eup %1001 }
 0x2c2   :  { %v497_v27 = vmul.f32 %v1002_v24, %v495_v25 }
 0x2c4   :  { %v499_v30 = vadd.f32 %v497_v27, %v481_v13 }
 0x2c5   :  { %v1004_v28 = vpop.eup %1003 }
 0x2c6   :  { %v498_v29 = vmul.f32 %v1004_v28, %v496_v26 }
 0x2c8   :  { %v500_v31 = vadd.f32 %v498_v29, %v485_v18 }
 0x2ca   :  { %v501_v32 = vpack.c.bf16 %v500_v31, %v499_v30 }
 0x2cc   :  { %910 = vmatmul.mubr.bf16.vlgmr.msra.gmra.mxu1 %v501_v32 }
 0x38c   :  { %v607_v37 = vpop.f32.mrf.mxu1 }
 0x38d   :  { %v608_v39 = vadd.f32 %v797_v36, %v607_v37 }
 0x38e   :  { %v911_v38 = vpop.f32.mrf.mxu1 }
 0x38f   :  { %v614_v43 = vmax.f32 %v608_v39, 0.0 }
 0x390   :  { %v610_v40 = vpop.f32.mrf.mxu1 }
 0x391   :  { %v611_v41 = vadd.f32 %v797_v36, %v610_v40 }
 0x392   :  { %v912_v42 = vpop.f32.mrf.mxu1 }
 0x393   :  { %v615_v44 = vmax.f32 %v611_v41, 0.0 }
 0x395   :  { %v616_v45 = vpack.c.bf16 %v615_v44, %v614_v43 }
 0x397   :  { %930 = vmatmul.mubr.bf16.vlgmr.msra.gmra.mxu0 %v616_v45 }
 0x457   :  { %v722_v46 = vpop.f32.mrf.mxu0 }
 0x458   :  { %v723_v47 = vadd.f32 %v806_v0, %v722_v46 }
 0x459   :  { %v931_v48 = vpop.f32.mrf.mxu0 }
 0x45a   :  { %v815_v49 = vmul.f32 -1.442695, %v723_v47 }
 0x45b   :  { %v725_v50 = vpop.f32.mrf.mxu0 }
 0x45c   :  { %1005 = vpow2.f32 %v815_v49  ;;  %v726_v51 = vadd.f32 %v806_v0, %v725_v50 }
 0x45d   :  { %v932_v52 = vpop.f32.mrf.mxu0 }
 0x45e   :  { %v816_v53 = vmul.f32 -1.442695, %v726_v51 }
 0x460   :  { %1007 = vpow2.f32 %v816_v53 }
 0x469   :  { %v1006_v54 = vpop.eup %1005 }
 0x46a   :  { %v735_v55 = vadd.f32 1.0, %v1006_v54 }
 0x46c   :  { %1009 = vrcp.f32 %v735_v55 }
 0x46d   :  { %v1008_v56 = vpop.eup %1007 }
 0x46e   :  { %v736_v57 = vadd.f32 1.0, %v1008_v56 }
 0x470   :  { %1011 = vrcp.f32 %v736_v57 }
 0x479   :  { %v1010_v58 = vpop.eup %1009 }
 0x47a   :  { %741 = vst [vmem:[%s1315_s12] sm:$0xff] %v1010_v58 }
 0x47d   :  { %v1012_v59 = vpop.eup %1011 }
 0x47e   :  { %742 = vst [vmem:[%s1315_s12 + $0x8] sm:$0xff] %v1012_v59 }
 0x47f   :  { %759 = vsyncpa [#allocation3], 1 }
 0x480   :  { %760 = vsyncpa [#allocation5], 1 }
 0x481   :  { %761 = vsyncpa [#allocation8], 1 }

</bundles_post_ra>
